<compile_context>
chip_gen: v7x
topology: tpu7x:2x2x1
jax: 0.10.0
libtpu: 0.0.40
codegen_flags: <defaults>
</compile_context>

<pallas_src>
import jax
import jax.numpy as jnp
from jax.experimental import pallas as pl
from jax.experimental.pallas import tpu as pltpu


# ----------------------------------------------------------------------------
# Kernel: fused 3-layer MLP (bf16 MXU matmuls, f32 accumulation, VPU epilogues)
# ----------------------------------------------------------------------------
def _mlp_kernel(x_ref, w1_ref, b1_ref, w2_ref, b2_ref, w3_ref, b3_ref, o_ref):
    """Linear(784,256)+ReLU -> Linear(256,64)+ReLU -> Linear(64,10pad128), fused."""
    x = x_ref[...].astype(jnp.bfloat16)                       # cast hidden under MXU
    h = jnp.dot(x, w1_ref[...], preferred_element_type=jnp.float32) + b1_ref[...]
    h = jnp.maximum(h, 0.0).astype(jnp.bfloat16)
    h = jnp.dot(h, w2_ref[...], preferred_element_type=jnp.float32) + b2_ref[...]
    h = jnp.maximum(h, 0.0).astype(jnp.bfloat16)
    o_ref[...] = (jnp.dot(h, w3_ref[...], preferred_element_type=jnp.float32)
                  + b3_ref[...]).astype(o_ref.dtype)


# ----------------------------------------------------------------------------
# Wrapper
# ----------------------------------------------------------------------------
def mlp_forward(x, params, *, block_m=512):
    """x: [N, ...] (e.g. NCHW [N,1,28,28]) -> logits [N, 10] (float32)."""
    (w1, b1), (w2, b2), (w3, b3) = params
    N = x.shape[0]
    d_in, d_h1 = w1.shape
    d_h2 = w2.shape[1]
    d_out = w3.shape[1]
    d_out_pad = 128  # lane-dense output width (multiple of 128)

    # nn.Flatten: contiguous row-major reshape, no data movement / transpose.
    xf = x.reshape(N, -1)
    assert xf.shape[1] == d_in, f"expected {d_in} flattened features, got {xf.shape[1]}"
    if xf.dtype not in (jnp.float32, jnp.bfloat16):
        xf = xf.astype(jnp.float32)
    # (If the upstream producer emits bf16 activations they are consumed as-is,
    #  halving the dominant HBM stream; no wrapper cast of x otherwise.)

    # Weights in bf16 (native MXU dtype); biases stay f32 (added post-accum).
    w1b = w1.astype(jnp.bfloat16)
    w2b = w2.astype(jnp.bfloat16)
    # Pad the last layer to 128 output lanes for unmasked, lane-dense stores.
    w3b = jnp.zeros((d_h2, d_out_pad), jnp.bfloat16).at[:, :d_out].set(
        w3.astype(jnp.bfloat16))
    b1p = b1.astype(jnp.float32).reshape(1, d_h1)
    b2p = b2.astype(jnp.float32).reshape(1, d_h2)
    b3p = jnp.zeros((1, d_out_pad), jnp.float32).at[0, :d_out].set(
        b3.astype(jnp.float32))

    # Batch tiling:
    #   N <= 16           : single full-extent block (always layout-legal).
    #   16 < N <= block_m : split into >= 2 tiles (8-aligned) so v7x's second
    #                       TensorCore gets work via the "parallel" axis.
    #   N > block_m       : standard block_m tiles.
    if N <= 16:
        bm = N
    elif N <= block_m:
        bm = min(block_m, ((N + 1) // 2 + 7) // 8 * 8)
    else:
        bm = block_m  # block_m must be a multiple of 8
    grid = (pl.cdiv(N, bm),)

    itemsize_x = jnp.dtype(xf.dtype).itemsize
    cost = pl.CostEstimate(
        flops=2 * N * (d_in * d_h1 + d_h1 * d_h2 + d_h2 * d_out),
        transcendentals=0,
        bytes_accessed=(N * d_in * itemsize_x            # x read
                        + N * d_out_pad * 4              # padded logits write
                        + (d_in * d_h1 + d_h1 * d_h2 + d_h2 * d_out_pad) * 2  # bf16 weights
                        + (d_h1 + d_h2 + d_out_pad) * 4),  # f32 biases
    )

    out_padded = pl.pallas_call(
        _mlp_kernel,
        out_shape=jax.ShapeDtypeStruct((N, d_out_pad), jnp.float32),
        grid=grid,
        in_specs=[
            pl.BlockSpec((bm, d_in), lambda i: (i, 0)),          # x, tiled on batch
            pl.BlockSpec((d_in, d_h1), lambda i: (0, 0)),        # w1 resident (bf16)
            pl.BlockSpec((1, d_h1), lambda i: (0, 0)),           # b1 (f32)
            pl.BlockSpec((d_h1, d_h2), lambda i: (0, 0)),        # w2 resident (bf16)
            pl.BlockSpec((1, d_h2), lambda i: (0, 0)),           # b2 (f32)
            pl.BlockSpec((d_h2, d_out_pad), lambda i: (0, 0)),   # w3 padded (bf16)
            pl.BlockSpec((1, d_out_pad), lambda i: (0, 0)),      # b3 padded (f32)
        ],
        out_specs=pl.BlockSpec((bm, d_out_pad), lambda i: (i, 0)),
        compiler_params=pltpu.CompilerParams(dimension_semantics=("parallel",)),
        cost_estimate=cost,
    )(xf, w1b, b1p, w2b, b2p, w3b, b3p)

    # Slice the lane-padded logits back to the true 10 classes.
    return out_padded[:, :d_out]


# ----------------------------------------------------------------------------
# Deterministic parameter initialization (shapes per the module's __init__)
# ----------------------------------------------------------------------------
def init_params(key):
    dims = [(784, 256), (256, 64), (64, 10)]
    keys = jax.random.split(key, 2 * len(dims))
    params = []
    for idx, (din, dout) in enumerate(dims):
        # Stored as (in_features, out_features) so the kernel computes x @ W + b,
        # mathematically equivalent to PyTorch's x @ W.T + b with W=(out,in).
        w = jax.random.normal(keys[2 * idx], (din, dout), jnp.float32) / jnp.sqrt(din)
        b = 0.01 * jax.random.normal(keys[2 * idx + 1], (dout,), jnp.float32)
        params.append((w, b))
    return params


if __name__ == "__main__":
    key = jax.random.PRNGKey(0)
    pkey, xkey = jax.random.split(key)
    params = init_params(pkey)

    # Input in PyTorch NCHW convention; Linear(784, 256) implies 1x28x28.
    x = jax.random.normal(xkey, (2, 1, 28, 28), jnp.float32)

    out = mlp_forward(x, params)
    out = jax.block_until_ready(out)

    # Correctness check against a plain-JAX reference mimicking the kernel's
    # bf16-matmul / f32-accumulate arithmetic.
    xf = x.reshape(x.shape[0], -1)
    (w1, b1), (w2, b2), (w3, b3) = params
    ref = jnp.dot(xf.astype(jnp.bfloat16), w1.astype(jnp.bfloat16),
                  preferred_element_type=jnp.float32) + b1
    ref = jnp.maximum(ref, 0.0)
    ref = jnp.dot(ref.astype(jnp.bfloat16), w2.astype(jnp.bfloat16),
                  preferred_element_type=jnp.float32) + b2
    ref = jnp.maximum(ref, 0.0)
    ref = jnp.dot(ref.astype(jnp.bfloat16), w3.astype(jnp.bfloat16),
                  preferred_element_type=jnp.float32) + b3

    # Loose sanity check against the full-f32 reference as well.
    ref32 = jnp.maximum(xf @ w1 + b1, 0.0)
    ref32 = jnp.maximum(ref32 @ w2 + b2, 0.0)
    ref32 = ref32 @ w3 + b3

    assert out.shape == (2, 10) and out.dtype == jnp.float32
    assert bool(jnp.all(jnp.isfinite(out)))
    assert bool(jnp.allclose(out, ref, atol=1e-2, rtol=1e-2))
    assert bool(jnp.allclose(out, ref32, atol=5e-2, rtol=5e-2))
    print("KERNEL_OK")
</pallas_src>

<mosaic_0001>
module attributes {stable_mosaic.version = 11 : i64} {
  func.func @_mlp_kernel(%arg0: i32, %arg1: memref<2x784xf32, #tpu.memory_space<vmem>>, %arg2: memref<784x256xbf16, #tpu.memory_space<vmem>>, %arg3: memref<1x256xf32, #tpu.memory_space<vmem>>, %arg4: memref<256x64xbf16, #tpu.memory_space<vmem>>, %arg5: memref<1x64xf32, #tpu.memory_space<vmem>>, %arg6: memref<64x128xbf16, #tpu.memory_space<vmem>>, %arg7: memref<1x128xf32, #tpu.memory_space<vmem>>, %arg8: memref<2x128xf32, #tpu.memory_space<vmem>>) attributes {dimension_semantics = [#tpu.dimension_semantics<parallel>], iteration_bounds = array<i64: 1>, scalar_prefetch = 0 : i64, scratch_operands = 0 : i64, tpu.core_type = #tpu.core_type<tc>, window_params = [{transform_indices = @transform_0, window_bounds = array<i64: 2, 784>}, {pipeline_mode = #tpu.pipeline_mode<synchronous>, transform_indices = @transform_1, window_bounds = array<i64: 784, 256>}, {pipeline_mode = #tpu.pipeline_mode<synchronous>, transform_indices = @transform_2, window_bounds = array<i64: 1, 256>}, {pipeline_mode = #tpu.pipeline_mode<synchronous>, transform_indices = @transform_3, window_bounds = array<i64: 256, 64>}, {pipeline_mode = #tpu.pipeline_mode<synchronous>, transform_indices = @transform_4, window_bounds = array<i64: 1, 64>}, {pipeline_mode = #tpu.pipeline_mode<synchronous>, transform_indices = @transform_5, window_bounds = array<i64: 64, 128>}, {pipeline_mode = #tpu.pipeline_mode<synchronous>, transform_indices = @transform_6, window_bounds = array<i64: 1, 128>}, {transform_indices = @transform_7, window_bounds = array<i64: 2, 128>}]} {
    %c0 = arith.constant 0 : index
    %c0_0 = arith.constant 0 : index
    %0 = vector.load %arg1[%c0, %c0_0] : memref<2x784xf32, #tpu.memory_space<vmem>>, vector<2x784xf32>
    %1 = arith.truncf %0 : vector<2x784xf32> to vector<2x784xbf16>
    %c0_1 = arith.constant 0 : index
    %c0_2 = arith.constant 0 : index
    %2 = vector.load %arg2[%c0_1, %c0_2] : memref<784x256xbf16, #tpu.memory_space<vmem>>, vector<784x256xbf16>
    %cst = arith.constant dense<0.000000e+00> : vector<2x256xf32>
    %3 = tpu.matmul %1, %2, %cst {dimension_numbers = #tpu.dot_dimension_numbers<[1], [0], [0], [1], [0, 0, 1, 1], [], []>} : vector<2x784xbf16>, vector<784x256xbf16>, vector<2x256xf32> -> vector<2x256xf32>
    %c0_3 = arith.constant 0 : index
    %c0_4 = arith.constant 0 : index
    %4 = vector.load %arg3[%c0_3, %c0_4] : memref<1x256xf32, #tpu.memory_space<vmem>>, vector<1x256xf32>
    %5 = vector.broadcast %4 : vector<1x256xf32> to vector<2x256xf32>
    %6 = arith.addf %3, %5 : vector<2x256xf32>
    %cst_5 = arith.constant 0.000000e+00 : f32
    %7 = vector.broadcast %cst_5 : f32 to vector<2x256xf32>
    %8 = arith.maximumf %6, %7 : vector<2x256xf32>
    %9 = arith.truncf %8 : vector<2x256xf32> to vector<2x256xbf16>
    %c0_6 = arith.constant 0 : index
    %c0_7 = arith.constant 0 : index
    %10 = vector.load %arg4[%c0_6, %c0_7] : memref<256x64xbf16, #tpu.memory_space<vmem>>, vector<256x64xbf16>
    %cst_8 = arith.constant dense<0.000000e+00> : vector<2x64xf32>
    %11 = tpu.matmul %9, %10, %cst_8 {dimension_numbers = #tpu.dot_dimension_numbers<[1], [0], [0], [1], [0, 0, 1, 1], [], []>} : vector<2x256xbf16>, vector<256x64xbf16>, vector<2x64xf32> -> vector<2x64xf32>
    %c0_9 = arith.constant 0 : index
    %c0_10 = arith.constant 0 : index
    %12 = vector.load %arg5[%c0_9, %c0_10] : memref<1x64xf32, #tpu.memory_space<vmem>>, vector<1x64xf32>
    %13 = vector.broadcast %12 : vector<1x64xf32> to vector<2x64xf32>
    %14 = arith.addf %11, %13 : vector<2x64xf32>
    %cst_11 = arith.constant 0.000000e+00 : f32
    %15 = vector.broadcast %cst_11 : f32 to vector<2x64xf32>
    %16 = arith.maximumf %14, %15 : vector<2x64xf32>
    %17 = arith.truncf %16 : vector<2x64xf32> to vector<2x64xbf16>
    %c0_12 = arith.constant 0 : index
    %c0_13 = arith.constant 0 : index
    %18 = vector.load %arg6[%c0_12, %c0_13] : memref<64x128xbf16, #tpu.memory_space<vmem>>, vector<64x128xbf16>
    %cst_14 = arith.constant dense<0.000000e+00> : vector<2x128xf32>
    %19 = tpu.matmul %17, %18, %cst_14 {dimension_numbers = #tpu.dot_dimension_numbers<[1], [0], [0], [1], [0, 0, 1, 1], [], []>} : vector<2x64xbf16>, vector<64x128xbf16>, vector<2x128xf32> -> vector<2x128xf32>
    %c0_15 = arith.constant 0 : index
    %c0_16 = arith.constant 0 : index
    %20 = vector.load %arg7[%c0_15, %c0_16] : memref<1x128xf32, #tpu.memory_space<vmem>>, vector<1x128xf32>
    %21 = vector.broadcast %20 : vector<1x128xf32> to vector<2x128xf32>
    %22 = arith.addf %19, %21 : vector<2x128xf32>
    %c0_17 = arith.constant 0 : index
    %c0_18 = arith.constant 0 : index
    %23 = vector.load %arg8[%c0_17, %c0_18] : memref<2x128xf32, #tpu.memory_space<vmem>>, vector<2x128xf32>
    tpu.vector_store %arg8[%c0_17, %c0_18], %22 {strides = array<i32>} : memref<2x128xf32, #tpu.memory_space<vmem>>, vector<2x128xf32>,
    return
  }
  func.func @transform_0(%arg0: i32) -> (i32, i32) {
    %c0_i32 = arith.constant 0 : i32
    %c0_i32_0 = arith.constant 0 : i32
    return %arg0, %c0_i32 : i32, i32
  }
  func.func @transform_1(%arg0: i32) -> (i32, i32) {
    %c0_i32 = arith.constant 0 : i32
    %c0_i32_0 = arith.constant 0 : i32
    %c0_i32_1 = arith.constant 0 : i32
    return %c0_i32, %c0_i32_0 : i32, i32
  }
  func.func @transform_2(%arg0: i32) -> (i32, i32) {
    %c0_i32 = arith.constant 0 : i32
    %c0_i32_0 = arith.constant 0 : i32
    %c0_i32_1 = arith.constant 0 : i32
    return %c0_i32, %c0_i32_0 : i32, i32
  }
  func.func @transform_3(%arg0: i32) -> (i32, i32) {
    %c0_i32 = arith.constant 0 : i32
    %c0_i32_0 = arith.constant 0 : i32
    %c0_i32_1 = arith.constant 0 : i32
    return %c0_i32, %c0_i32_0 : i32, i32
  }
  func.func @transform_4(%arg0: i32) -> (i32, i32) {
    %c0_i32 = arith.constant 0 : i32
    %c0_i32_0 = arith.constant 0 : i32
    %c0_i32_1 = arith.constant 0 : i32
    return %c0_i32, %c0_i32_0 : i32, i32
  }
  func.func @transform_5(%arg0: i32) -> (i32, i32) {
    %c0_i32 = arith.constant 0 : i32
    %c0_i32_0 = arith.constant 0 : i32
    %c0_i32_1 = arith.constant 0 : i32
    return %c0_i32, %c0_i32_0 : i32, i32
  }
  func.func @transform_6(%arg0: i32) -> (i32, i32) {
    %c0_i32 = arith.constant 0 : i32
    %c0_i32_0 = arith.constant 0 : i32
    %c0_i32_1 = arith.constant 0 : i32
    return %c0_i32, %c0_i32_0 : i32, i32
  }
  func.func @transform_7(%arg0: i32) -> (i32, i32) {
    %c0_i32 = arith.constant 0 : i32
    %c0_i32_0 = arith.constant 0 : i32
    return %arg0, %c0_i32 : i32, i32
  }
}

</mosaic_0001>

<bundles_post_ra>
// kernel: tpu_custom_call.1
= control target key start
LH: loop header
LB: loop body
LE: loop exit
PB: predicated region body
PF: predicated region fallthrough
CT: control target
= control target key end

     0   :  { %12 = vsyncpa [#allocation3], 0  ;;  %s1713_s0 = inlined_call_operand.vmem [shape: f32[2,784], index: 0, kind: input, shape index: {}]   ;;  %s1714_s1 = inlined_call_operand.hbm [shape: bf16[784,256], index: 1, kind: input, shape index: {}]   ;;  %s1715_s2 = inlined_call_operand.vmem [shape: f32[1,256], index: 2, kind: input, shape index: {}]   ;;  %s1716_s3 = inlined_call_operand.vmem [shape: bf16[256,64], index: 3, kind: input, shape index: {}]   ;;  %s1717_s4 = inlined_call_operand.vmem [shape: f32[1,64], index: 4, kind: input, shape index: {}]   ;;  %s1718_s5 = inlined_call_operand.vmem [shape: bf16[64,128], index: 5, kind: input, shape index: {}]   ;;  %s1719_s6 = inlined_call_operand.vmem [shape: f32[1,128], index: 6, kind: input, shape index: {}]   ;;  %s1720_s7 = inlined_call_operand.hbm [shape: f32[2,128], index: 7, kind: output, shape index: {}]  }
   0x1   :  { %13 = vsyncpa [#allocation4], 0  ;;  %s1537_s24 = smov [#allocation2]   ;;  %s1489_s28 = scalar_lea.hbm %s1714_s1, 12544 }
   0x2   :  { %s21_s25 = sshll.u32 %s1537_s24, 4  ;;  %p1490_p0 = scmp.ne.s32.totalorder %s1714_s1, %s1489_s28  ;;  %s22_s25 = int_to_ptr.vmem [resolvable:$true] %s21_s25 }
   0x3   :  { %p1493_p1 = scmp.lt.u32.totalorder %s1489_s28, %s1714_s1 }
   0x5   :  { %p1495_p2 = pnand %p1493_p1, %p1490_p0 }
   0x7   :  { %1498 = shalt.err (!%p1495_p2)
}
   0x8   :  { %s1499_s10 = scalar_lea.vmem %s22_s25, 12544  ;;  %p1504_p4 = scmp.lt.s32.totalorder %s22_s25, %s22_s25 }
   0x9   :  { %p1500_p3 = scmp.ne.s32.totalorder %s22_s25, %s1499_s10  ;;  %p1505_p5 = scmp.lt.s32.totalorder %s1499_s10, %s1499_s10 }
   0xb   :  { %p1506_p6 = por %p1505_p5, %p1504_p4 }
   0xd   :  { %p1507_p7 = pnand %p1506_p6, %p1500_p3 }
   0xf   :  { %1510 = shalt.err (!%p1507_p7)
}
  0x10   :  { %s1538_s11 = smov 128   ;;  %s1539_s12 = smov 8  }
  0x11   :  { %27 = dma.hbm_to_vmem [thread:$0]  %s1714_s1, 12544, %s22_s25, [#allocation3], %s1538_s11, %s1538_s11, %s1539_s12  }
  0x12   :  { %1533 = dma.done.wait [#allocation3], 12544  }
  0x13   :  { %1534 = vsyncadd [#allocation3], 4294954752  ;;  %v1320_v0 = vld [vmem:[#allocation2 + $0x104] ss:$8 sps:$4 sm:$0xff]   ;;  %v1322_v1 = vld [vmem:[#allocation2 + $0x100] ss:$8 sps:$4 sm:$0xff]   ;;  %v50_v13 = vlaneseq }
  0x14   :  { %738 = vmatprep.subr.bf16.mxu0 %v1320_v0  ;;  %v1323_v2 = vld [vmem:[#allocation2 + $0x114] ss:$8 sps:$4 sm:$0xff]   ;;  %v1325_v3 = vld [vmem:[#allocation2 + $0x110] ss:$8 sps:$4 sm:$0xff]   ;;  %v1326_v4 = vld [vmem:[#allocation2 + $0x124] ss:$8 sps:$4 sm:$0xff]  }
  0x15   :  { %739 = vmatpush1.bf16.msra.mxu0 %v1322_v1  ;;  %v1328_v5 = vld [vmem:[#allocation2 + $0x120] ss:$8 sps:$4 sm:$0xff]   ;;  %v1329_v6 = vld [vmem:[#allocation2 + $0x134] ss:$8 sps:$4 sm:$0xff]   ;;  %v1331_v7 = vld [vmem:[#allocation2 + $0x130] ss:$8 sps:$4 sm:$0xff]  }
  0x16   :  { %740 = vmatprep.subr.bf16.mxu0 %v1323_v2  ;;  %v1332_v8 = vld [vmem:[#allocation2 + $0x144] ss:$8 sps:$4 sm:$0xff]   ;;  %v1334_v9 = vld [vmem:[#allocation2 + $0x140] ss:$8 sps:$4 sm:$0xff]   ;;  %v1335_v10 = vld [vmem:[#allocation2 + $0x154] ss:$8 sps:$4 sm:$0xff]  }
  0x17   :  { %v1540_v11 = vmov 1983009808   ;;  %v1337_v14 = vld [vmem:[#allocation2 + $0x150] ss:$8 sps:$4 sm:$0xff]   ;;  %v1362_v15 = vld [vmem:[#allocation2 + $0x4] ss:$8 sps:$4 sm:$0xff]  }
  0x18   :  { %v48_v12 = vunpack.c.l.s4 %v1540_v11  ;;  %v1364_v16 = vld [vmem:[#allocation2] ss:$8 sps:$4 sm:$0xff]   ;;  %v1338_v17 = vld [vmem:[#allocation2 + $0x164] ss:$8 sps:$4 sm:$0xff]   ;;  %v1597_v19 = vshrl.u32 %v50_v13, 7  ;;  %697 = vmatprep.subr.bf16.mxu1 %v1362_v15  ;;  %vm693_vm0 = vcmask 130048  }
  0x19   :  { %741 = vmatpush1.bf16.msra.mxu0 %v1325_v3  ;;  %698 = vmatpush1.bf16.msra.mxu1 %v1364_v16  ;;  %v1368_v20 = vld [vmem:[#allocation2 + $0x14] ss:$8 sps:$4 sm:$0xff]   ;;  %v1370_v21 = vld [vmem:[#allocation2 + $0x10] ss:$8 sps:$4 sm:$0xff]   ;;  %v1340_v22 = vld [vmem:[#allocation2 + $0x160] ss:$8 sps:$4 sm:$0xff]  }
  0x1a   :  { %742 = vmatprep.subr.bf16.mxu0 %v1326_v4  ;;  %v49_v18 = vunpack.c.0.s8 %v48_v12  ;;  %v1341_v23 = vld [vmem:[#allocation2 + $0x174] ss:$8 sps:$4 sm:$0xff]   ;;  %699 = vmatprep.subr.bf16.mxu1 %v1368_v20  ;;  %v1374_v24 = vld [vmem:[#allocation2 + $0x24] ss:$8 sps:$4 sm:$0xff]   ;;  %v1343_v27 = vld [vmem:[#allocation2 + $0x170] ss:$8 sps:$4 sm:$0xff]  }
  0x1b   :  { %v42_v26 = vld [vmem:[%s1713_s0] sm:$0xff]  ;;  %v1381_v31 = vld [vmem:[#allocation2 + $0x34] ss:$8 sps:$4 sm:$0xff]   ;;  %v1383_v37 = vld [vmem:[#allocation2 + $0x30] ss:$8 sps:$4 sm:$0xff]   ;;  %vm1543_vm1 = vmmov 0  }
  0x1c   :  { %v1600_v25 = vsub.s32 %v49_v18, %v1597_v19  ;;  %v1376_v28 = vld [vmem:[#allocation2 + $0x20] ss:$8 sps:$4 sm:$0xff]   ;;  %v46_v29 = vcombine.high %v42_v26, %v42_v26  ;;  %v1344_v32 = vld [vmem:[#allocation2 + $0x184] ss:$8 sps:$4 sm:$0xff]   ;;  %v1347_v40 = vld [vmem:[#allocation2 + $0x194] ss:$8 sps:$4 sm:$0xff]  }
  0x1d   :  { %743 = vmatpush1.bf16.msra.mxu0 %v1328_v5  ;;  %700 = vmatpush1.bf16.msra.mxu1 %v1370_v21  ;;  %v1346_v35 = vld [vmem:[#allocation2 + $0x180] ss:$8 sps:$4 sm:$0xff]   ;;  %v1387_v39 = vld [vmem:[#allocation2 + $0x44] ss:$8 sps:$4 sm:$0xff]   ;;  %v1349_v42 = vld [vmem:[#allocation2 + $0x190] ss:$8 sps:$4 sm:$0xff]  }
  0x1e   :  { %744 = vmatprep.subr.bf16.mxu0 %v1329_v6  ;;  %v1606_v30 = vrot.slane %v42_v26, %v1600_v25  ;;  %701 = vmatprep.subr.bf16.mxu1 %v1374_v24  ;;  %v1609_v33 = vrot.slane %v46_v29, %v1600_v25  ;;  %v1389_v43 = vld [vmem:[#allocation2 + $0x40] ss:$8 sps:$4 sm:$0xff]   ;;  %v1393_v44 = vld [vmem:[#allocation2 + $0x54] ss:$8 sps:$4 sm:$0xff]   ;;  %v1350_v45 = vld [vmem:[#allocation2 + $0x1a4] ss:$8 sps:$4 sm:$0xff]  }
  0x1f   :  { %v1352_v46 = vld [vmem:[#allocation2 + $0x1a0] ss:$8 sps:$4 sm:$0xff]   ;;  %v1395_v47 = vld [vmem:[#allocation2 + $0x50] ss:$8 sps:$4 sm:$0xff]   ;;  %v1399_v48 = vld [vmem:[#allocation2 + $0x64] ss:$8 sps:$4 sm:$0xff]  }
  0x20   :  { %v61_v34 = vcombine.high %v1606_v30, %v1606_v30  ;;  %v62_v36 = vcombine.high %v1609_v33, %v1609_v33  ;;  %v1353_v49 = vld [vmem:[#allocation2 + $0x1b4] ss:$8 sps:$4 sm:$0xff]   ;;  %v1355_v50 = vld [vmem:[#allocation2 + $0x1b0] ss:$8 sps:$4 sm:$0xff]   ;;  %v1401_v51 = vld [vmem:[#allocation2 + $0x60] ss:$8 sps:$4 sm:$0xff]  }
  0x21   :  { %745 = vmatpush1.bf16.msra.mxu0 %v1331_v7  ;;  %702 = vmatpush1.bf16.msra.mxu1 %v1376_v28  ;;  %v1405_v52 = vld [vmem:[#allocation2 + $0x74] ss:$8 sps:$4 sm:$0xff]   ;;  %v1356_v53 = vld [vmem:[#allocation2 + $0x1c4] ss:$8 sps:$4 sm:$0xff]   ;;  %v1358_v54 = vld [vmem:[#allocation2 + $0x1c0] ss:$8 sps:$4 sm:$0xff]   ;;  %v88_v7 = vpack.c.bf16 %v1609_v33, %v1609_v33 }
  0x22   :  { %746 = vmatprep.subr.bf16.mxu0 %v1332_v8  ;;  %v87_v38 = vpack.c.bf16 %v61_v34, %v61_v34  ;;  %703 = vmatprep.subr.bf16.mxu1 %v1381_v31  ;;  %v89_v41 = vpack.c.bf16 %v62_v36, %v62_v36  ;;  %v1407_v55 = vld [vmem:[#allocation2 + $0x70] ss:$8 sps:$4 sm:$0xff]   ;;  %v1411_v56 = vld [vmem:[#allocation2 + $0x84] ss:$8 sps:$4 sm:$0xff]   ;;  %v1359_v57 = vld [vmem:[#allocation2 + $0x1d4] ss:$8 sps:$4 sm:$0xff]   ;;  %v86_v34 = vpack.c.bf16 %v1606_v30, %v1606_v30 }
  0x23   :  { %v1361_v58 = vld [vmem:[#allocation2 + $0x1d0] ss:$8 sps:$4 sm:$0xff]   ;;  %v1413_v59 = vld [vmem:[#allocation2 + $0x80] ss:$8 sps:$4 sm:$0xff]   ;;  %v1417_v60 = vld [vmem:[#allocation2 + $0x94] ss:$8 sps:$4 sm:$0xff]  }
  0x24   :  { %729 = vmatprep.mubr.bf16.mxu1 %v87_v38  ;;  %770 = vmatprep.mubr.bf16.mxu0 %v89_v41  ;;  %v1365_v61 = vld [vmem:[#allocation2 + $0x1e4] ss:$8 sps:$4 sm:$0xff]   ;;  %v1367_v62 = vld [vmem:[#allocation2 + $0x1e0] ss:$8 sps:$4 sm:$0xff]   ;;  %v1419_v63 = vld [vmem:[#allocation2 + $0x90] ss:$8 sps:$4 sm:$0xff]  }
  0x25   :  { %747 = vmatpush1.bf16.msra.mxu0 %v1334_v9  ;;  %704 = vmatpush1.bf16.msra.mxu1 %v1383_v37  ;;  %v1423_v0 = vld [vmem:[#allocation2 + $0xa4] ss:$8 sps:$4 sm:$0xff]   ;;  %v1371_v1 = vld [vmem:[#allocation2 + $0x1f4] ss:$8 sps:$4 sm:$0xff]   ;;  %v1373_v2 = vld [vmem:[#allocation2 + $0x1f0] ss:$8 sps:$4 sm:$0xff]  }
  0x26   :  { %748 = vmatprep.subr.bf16.mxu0 %v1335_v10  ;;  %705 = vmatprep.subr.bf16.mxu1 %v1387_v39  ;;  %v1425_v3 = vld [vmem:[#allocation2 + $0xa0] ss:$8 sps:$4 sm:$0xff]   ;;  %v1429_v4 = vld [vmem:[#allocation2 + $0xb4] ss:$8 sps:$4 sm:$0xff]   ;;  %v1380_v5 = vld [vmem:[#allocation2 + $0x204] ss:$8 sps:$4 sm:$0xff]  }
  0x27   :  { %v1378_v6 = vld [vmem:[#allocation2 + $0x200] ss:$8 sps:$4 sm:$0xff]   ;;  %v1431_v8 = vld [vmem:[#allocation2 + $0xb0] ss:$8 sps:$4 sm:$0xff]   ;;  %v1435_v9 = vld [vmem:[#allocation2 + $0xc4] ss:$8 sps:$4 sm:$0xff]  }
  0x28   :  { %v1386_v10 = vld [vmem:[#allocation2 + $0x214] ss:$8 sps:$4 sm:$0xff]   ;;  %v1384_v11 = vld [vmem:[#allocation2 + $0x210] ss:$8 sps:$4 sm:$0xff]   ;;  %v43_v12 = vld [vmem:[%s1713_s0 + $0x8] sm:$0x3f] }
  0x29   :  { %749 = vmatpush1.bf16.msra.mxu0 %v1337_v14  ;;  %706 = vmatpush1.bf16.msra.mxu1 %v1389_v43  ;;  %v1437_v13 = vld [vmem:[#allocation2 + $0xc0] ss:$8 sps:$4 sm:$0xff]   ;;  %v1621_v14 = vrot.slane %v43_v12, %v1600_v25  ;;  %v1441_v15 = vld [vmem:[#allocation2 + $0xd4] ss:$8 sps:$4 sm:$0xff]   ;;  %v1392_v16 = vld [vmem:[#allocation2 + $0x224] ss:$8 sps:$4 sm:$0xff]  }
  0x2a   :  { %750 = vmatprep.subr.bf16.mxu0 %v1338_v17  ;;  %707 = vmatprep.subr.bf16.mxu1 %v1393_v44  ;;  %v1390_v18 = vld [vmem:[#allocation2 + $0x220] ss:$8 sps:$4 sm:$0xff]   ;;  %v1398_v20 = vld [vmem:[#allocation2 + $0x234] ss:$8 sps:$4 sm:$0xff]   ;;  %v1443_v21 = vld [vmem:[#allocation2 + $0xd0] ss:$8 sps:$4 sm:$0xff]  }
  0x2b   :  { %v78_v17 = vcombine.high %v1621_v14, %v1621_v14  ;;  %v1449_v24 = vld [vmem:[#allocation2 + $0xe0] ss:$8 sps:$4 sm:$0xff]   ;;  %v1396_v26 = vld [vmem:[#allocation2 + $0x230] ss:$8 sps:$4 sm:$0xff]   ;;  %v1404_v28 = vld [vmem:[#allocation2 + $0x244] ss:$8 sps:$4 sm:$0xff]  }
  0x2c   :  { %v1455_v29 = vld [vmem:[#allocation2 + $0xf0] ss:$8 sps:$4 sm:$0xff]   ;;  %v1402_v31 = vld [vmem:[#allocation2 + $0x240] ss:$8 sps:$4 sm:$0xff]   ;;  %v1410_v33 = vld [vmem:[#allocation2 + $0x254] ss:$8 sps:$4 sm:$0xff]  }
  0x2d   :  { %751 = vmatpush1.bf16.msra.mxu0 %v1340_v22  ;;  %708 = vmatpush1.bf16.msra.mxu1 %v1395_v47  ;;  %v91_v22 = vpack.c.bf16 %v78_v17, %v78_v17  ;;  %v1462_v36 = vld [vmem:[#allocation2 + $0x300] ss:$8 sps:$4 sm:$0xff]   ;;  %v1408_v37 = vld [vmem:[#allocation2 + $0x250] ss:$8 sps:$4 sm:$0xff]   ;;  %v1416_v39 = vld [vmem:[#allocation2 + $0x264] ss:$8 sps:$4 sm:$0xff]  }
  0x2e   :  { %752 = vmatprep.subr.bf16.mxu0 %v1341_v23  ;;  %709 = vmatprep.subr.bf16.mxu1 %v1399_v48  ;;  %v1447_v23 = vld [vmem:[#allocation2 + $0xe4] ss:$8 sps:$4 sm:$0xff]   ;;  %v1541_v41 = vmov 0   ;;  %v1414_v30 = vld [vmem:[#allocation2 + $0x260] ss:$8 sps:$4 sm:$0xff]   ;;  %vm1081_vm2 = vcmask 523264  }
  0x2f   :  { %v1469_v38 = vld [vmem:[%s1716_s3 + $0x40] sm:$0xff]   ;;  %v1472_v47 = vld [vmem:[%s1716_s3 + $0x8] sm:$0xff]  }
  0x30   :  { %v1470_v44 = vld [vmem:[%s1716_s3] sm:$0xff]  }
  0x31   :  { %753 = vmatpush1.bf16.msra.mxu0 %v1343_v27  ;;  %710 = vmatpush1.bf16.msra.mxu1 %v1401_v51  ;;  %v1453_v27 = vld [vmem:[#allocation2 + $0xf4] ss:$8 sps:$4 sm:$0xff]   ;;  %v1426_v48 = vld [vmem:[#allocation2 + $0x280] ss:$8 sps:$4 sm:$0xff]  }
  0x32   :  { %754 = vmatprep.subr.bf16.mxu0 %v1344_v32  ;;  %711 = vmatprep.subr.bf16.mxu1 %v1405_v52  ;;  %v1464_v32 = vld [vmem:[#allocation2 + $0x304] ss:$8 sps:$4 sm:$0xff]   ;;  %v1474_v51 = vld [vmem:[%s1716_s3 + $0x10] sm:$0xff]  }
  0x33   :  { %v1432_v52 = vld [vmem:[#allocation2 + $0x290] ss:$8 sps:$4 sm:$0xff]  }
  0x35   :  { %755 = vmatpush1.bf16.msra.mxu0 %v1346_v35  ;;  %712 = vmatpush1.bf16.msra.mxu1 %v1407_v55  ;;  %v63_v35 = vcombine.high %v43_v12, %v43_v12  ;;  %v1446_v55 = vld [vmem:[#allocation2 + $0x2b4] ss:$8 sps:$4 sm:$0xff]   ;;  %v1542_v12 = vmov 0.0  }
  0x36   :  { %756 = vmatprep.subr.bf16.mxu0 %v1347_v40  ;;  %713 = vmatprep.subr.bf16.mxu1 %v1411_v56  ;;  %v1444_v56 = vld [vmem:[#allocation2 + $0x2b0] ss:$8 sps:$4 sm:$0xff]  }
  0x37   :  { %v77_v40 = vrot.slane %v63_v35, %v1600_v25  ;;  %v1471_v25 = vld [vmem:[%s1716_s3 + $0x48] sm:$0xff]  }
  0x39   :  { %757 = vmatpush1.bf16.msra.mxu0 %v1349_v42  ;;  %714 = vmatpush1.bf16.msra.mxu1 %v1413_v59  ;;  %v1422_v42 = vld [vmem:[#allocation2 + $0x274] ss:$8 sps:$4 sm:$0xff]   ;;  %v92_v43 = vpack.c.bf16 %v77_v40, %v77_v40 }
  0x3a   :  { %758 = vmatprep.subr.bf16.mxu0 %v1350_v45  ;;  %715 = vmatprep.subr.bf16.mxu1 %v1417_v60  ;;  %v1420_v45 = vld [vmem:[#allocation2 + $0x270] ss:$8 sps:$4 sm:$0xff]   ;;  %v1458_v59 = vld [vmem:[#allocation2 + $0x2d4] ss:$8 sps:$4 sm:$0xff]  }
  0x3b   :  { %v1456_v60 = vld [vmem:[#allocation2 + $0x2d0] ss:$8 sps:$4 sm:$0xff]  }
  0x3d   :  { %759 = vmatpush1.bf16.msra.mxu0 %v1352_v46  ;;  %716 = vmatpush1.bf16.msra.mxu1 %v1419_v63  ;;  %v1428_v46 = vld [vmem:[#allocation2 + $0x284] ss:$8 sps:$4 sm:$0xff]   ;;  %v1467_v63 = vld [vmem:[#allocation2 + $0x2f4] ss:$8 sps:$4 sm:$0xff]  }
  0x3e   :  { %760 = vmatprep.subr.bf16.mxu0 %v1353_v49  ;;  %717 = vmatprep.subr.bf16.mxu1 %v1423_v0  ;;  %v1473_v49 = vld [vmem:[%s1716_s3 + $0x50] sm:$0xff]  }
  0x3f   :  { %v1465_v0 = vld [vmem:[#allocation2 + $0x2f0] ss:$8 sps:$4 sm:$0xff]  }
  0x41   :  { %761 = vmatpush1.bf16.msra.mxu0 %v1355_v50  ;;  %718 = vmatpush1.bf16.msra.mxu1 %v1425_v3  ;;  %v1434_v50 = vld [vmem:[#allocation2 + $0x294] ss:$8 sps:$4 sm:$0xff]  }
  0x42   :  { %762 = vmatprep.subr.bf16.mxu0 %v1356_v53  ;;  %719 = vmatprep.subr.bf16.mxu1 %v1429_v4  ;;  %v1440_v53 = vld [vmem:[#allocation2 + $0x2a4] ss:$8 sps:$4 sm:$0xff]   ;;  %v1476_v3 = vld [vmem:[%s1716_s3 + $0x18] sm:$0xff]  }
  0x43   :  { %v1477_v4 = vld [vmem:[%s1716_s3 + $0x60] sm:$0xff]  }
  0x45   :  { %763 = vmatpush1.bf16.msra.mxu0 %v1358_v54  ;;  %720 = vmatpush1.bf16.msra.mxu1 %v1431_v8  ;;  %v1438_v54 = vld [vmem:[#allocation2 + $0x2a0] ss:$8 sps:$4 sm:$0xff]   ;;  %v1481_v8 = vld [vmem:[%s1716_s3 + $0x70] sm:$0xff]  }
  0x46   :  { %764 = vmatprep.subr.bf16.mxu0 %v1359_v57  ;;  %721 = vmatprep.subr.bf16.mxu1 %v1435_v9  ;;  %v1452_v57 = vld [vmem:[#allocation2 + $0x2c4] ss:$8 sps:$4 sm:$0xff]   ;;  %v1482_v9 = vld [vmem:[%s1716_s3 + $0x30] sm:$0xff]  }
  0x49   :  { %765 = vmatpush1.bf16.msra.mxu0 %v1361_v58  ;;  %722 = vmatpush1.bf16.msra.mxu1 %v1437_v13  ;;  %v1450_v58 = vld [vmem:[#allocation2 + $0x2c0] ss:$8 sps:$4 sm:$0xff]  }
  0x4a   :  { %766 = vmatprep.subr.bf16.mxu0 %v1365_v61  ;;  %723 = vmatprep.subr.bf16.mxu1 %v1441_v15  ;;  %v1461_v61 = vld [vmem:[#allocation2 + $0x2e4] ss:$8 sps:$4 sm:$0xff]  }
  0x4d   :  { %767 = vmatpush1.bf16.msra.mxu0 %v1367_v62  ;;  %724 = vmatpush1.bf16.msra.mxu1 %v1443_v21  ;;  %v1459_v62 = vld [vmem:[#allocation2 + $0x2e0] ss:$8 sps:$4 sm:$0xff]  }
  0x4e   :  { %768 = vmatprep.subr.bf16.mxu0 %v1371_v1  ;;  %725 = vmatprep.subr.bf16.mxu1 %v1447_v23  ;;  %v90_v1 = vpack.c.bf16 %v1621_v14, %v1621_v14  ;;  %v191_v23 = vld [vmem:[%s1715_s2] sm:$0x3] }
  0x51   :  { %769 = vmatpush1.bf16.msra.mxu0 %v1373_v2  ;;  %726 = vmatpush1.bf16.msra.mxu1 %v1449_v24  ;;  %v1475_v2 = vld [vmem:[%s1716_s3 + $0x58] sm:$0xff]   ;;  %v199_v24 = vsub.s32 1, %v1597_v19 }
  0x52   :  { %779 = vmatprep.subr.bf16.mxu0 %v1380_v5  ;;  %727 = vmatprep.subr.bf16.mxu1 %v1453_v27  ;;  %v1478_v5 = vld [vmem:[%s1716_s3 + $0x20] sm:$0xff]  }
  0x53   :  { %v200_v27 = vrot.slane %v191_v23, %v199_v24 }
  0x54   :  { %771 = vmatmul.mubr.bf16.vlgmr.msra.gmra.mrb[0].mxu0 %v88_v7  ;;  %v1480_v7 = vld [vmem:[%s1716_s3 + $0x28] sm:$0xff]  }
  0x55   :  { %780 = vmatpush1.bf16.msra.mxu0 %v1378_v6  ;;  %811 = vmatprep.mubr.bf16.mxu0 %v91_v22  ;;  %v1479_v6 = vld [vmem:[%s1716_s3 + $0x68] sm:$0xff]   ;;  %v195_v22 = vsub.s32 0, %v1597_v19 }
  0x56   :  { %781 = vmatprep.subr.bf16.mxu0 %v1386_v10  ;;  %728 = vmatpush1.bf16.msra.mxu1 %v1455_v29  ;;  %v1483_v10 = vld [vmem:[%s1716_s3 + $0x78] sm:$0xff]  }
  0x57   :  { %820 = vmatprep.subr.bf16.mxu1 %v1464_v32 }
  0x59   :  { %782 = vmatpush1.bf16.msra.mxu0 %v1384_v11  ;;  %730 = vmatmul.mubr.bf16.vlgmr.msra.gmra.mrb[0].mxu1 %v86_v34  ;;  %v1484_v11 = vld [vmem:[%s1716_s3 + $0x38] sm:$0xff]  }
  0x5a   :  { %783 = vmatprep.subr.bf16.mxu0 %v1392_v16  ;;  %821 = vmatpush1.bf16.msra.mxu1 %v1462_v36 }
  0x5b   :  { %852 = vmatprep.mubr.bf16.mxu1 %v1541_v41  ;;  %1263 = vmatprep.subr.bf16.mxu1 %v1469_v38 }
  0x5d   :  { %784 = vmatpush1.bf16.msra.mxu0 %v1390_v18 }
  0x5e   :  { %785 = vmatprep.subr.bf16.mxu0 %v1398_v20 }
  0x61   :  { %786 = vmatpush1.bf16.msra.mxu0 %v1396_v26  ;;  %1239 = vmatmul.mubr.msk.bf16.vlgmr.msra.gmra.mrb[4].mxu1 %vm693_vm0, %v92_v43  ;;  %v196_v26 = vrot.slane %v191_v23, %v195_v22  ;;  %v1487_v43 = vld [vmem:[%s1718_s5 + $0x10] sm:$0xff]  }
  0x62   :  { %787 = vmatprep.subr.bf16.mxu0 %v1404_v28  ;;  %1264 = vmatpush3.bf16.msra.mxu1 %v1470_v44  ;;  %v1488_v44 = vld [vmem:[%s1718_s5 + $0x18] sm:$0xff]  }
  0x63   :  { %1265 = vmatprep.subr.bf16.mxu1 %v1471_v25  ;;  %v1240_v25 = vld [vmem:[%s1717_s4] ss:$0 sm:$0xff] }
  0x65   :  { %788 = vmatpush1.bf16.msra.mxu0 %v1402_v31 }
  0x66   :  { %789 = vmatprep.subr.bf16.mxu0 %v1410_v33  ;;  %1266 = vmatpush3.bf16.msra.mxu1 %v1472_v47 }
  0x67   :  { %1267 = vmatprep.subr.bf16.mxu1 %v1473_v49 }
  0x69   :  { %790 = vmatpush1.bf16.msra.mxu0 %v1408_v37 }
  0x6a   :  { %791 = vmatprep.subr.bf16.mxu0 %v1416_v39  ;;  %1268 = vmatpush3.bf16.msra.mxu1 %v1474_v51 }
  0x6b   :  { %1269 = vmatprep.subr.bf16.mxu1 %v1475_v2 }
  0x6d   :  { %792 = vmatpush1.bf16.msra.mxu0 %v1414_v30  ;;  %v1485_v30 = vld [vmem:[%s1718_s5] sm:$0xff]  }
  0x6e   :  { %793 = vmatprep.subr.bf16.mxu0 %v1422_v42  ;;  %1270 = vmatpush3.bf16.msra.mxu1 %v1476_v3  ;;  %v1486_v42 = vld [vmem:[%s1718_s5 + $0x8] sm:$0xff]   ;;  %s1544_s5 = smov [#allocation5]  }
  0x6f   :  { %1271 = vmatprep.subr.bf16.mxu1 %v1477_v4  ;;  %s1132_s13 = sshll.u32 %s1544_s5, 4  ;;  %s1133_s13 = int_to_ptr.vmem [resolvable:$true] %s1132_s13 }
  0x70   :  { %s1511_s4 = scalar_lea.vmem %s1133_s13, 32  ;;  %p1516_p9 = scmp.lt.s32.totalorder %s1133_s13, %s1133_s13 }
  0x71   :  { %794 = vmatpush1.bf16.msra.mxu0 %v1420_v45  ;;  %p1512_p8 = scmp.ne.s32.totalorder %s1133_s13, %s1511_s4  ;;  %p1517_p10 = scmp.lt.s32.totalorder %s1511_s4, %s1511_s4 }
  0x72   :  { %795 = vmatprep.subr.bf16.mxu0 %v1428_v46  ;;  %1272 = vmatpush3.bf16.msra.mxu1 %v1478_v5 }
  0x73   :  { %1273 = vmatprep.subr.bf16.mxu1 %v1479_v6  ;;  %p1518_p11 = por %p1517_p10, %p1516_p9 }
  0x75   :  { %796 = vmatpush1.bf16.msra.mxu0 %v1426_v48  ;;  %p1519_p12 = pnand %p1518_p11, %p1512_p8 }
  0x76   :  { %797 = vmatprep.subr.bf16.mxu0 %v1434_v50  ;;  %1274 = vmatpush3.bf16.msra.mxu1 %v1480_v7 }
  0x77   :  { %1275 = vmatprep.subr.bf16.mxu1 %v1481_v8 }
  0x79   :  { %798 = vmatpush1.bf16.msra.mxu0 %v1432_v52 }
  0x7a   :  { %799 = vmatprep.subr.bf16.mxu0 %v1440_v53  ;;  %1276 = vmatpush3.bf16.msra.mxu1 %v1482_v9  ;;  %v1257_v53 = vld [vmem:[%s1719_s6] ss:$0 sm:$0xff] }
  0x7b   :  { %1277 = vmatprep.subr.bf16.mxu1 %v1483_v10 }
  0x7d   :  { %800 = vmatpush1.bf16.msra.mxu0 %v1438_v54 }
  0x7e   :  { %801 = vmatprep.subr.bf16.mxu0 %v1446_v55  ;;  %1278 = vmatpush3.bf16.msra.mxu1 %v1484_v11 }
  0x7f   :  { %1290 = vmatprep.subr.bf16.mxu1 %v1542_v12 }
  0x81   :  { %802 = vmatpush1.bf16.msra.mxu0 %v1444_v56 }
  0x82   :  { %803 = vmatprep.subr.bf16.mxu0 %v1452_v57 }
  0x85   :  { %804 = vmatpush1.bf16.msra.mxu0 %v1450_v58 }
  0x86   :  { %805 = vmatprep.subr.bf16.mxu0 %v1458_v59 }
  0x89   :  { %806 = vmatpush1.bf16.msra.mxu0 %v1456_v60 }
  0x8a   :  { %807 = vmatprep.subr.bf16.mxu0 %v1461_v61 }
  0x8d   :  { %808 = vmatpush1.bf16.msra.mxu0 %v1459_v62 }
  0x8e   :  { %809 = vmatprep.subr.bf16.mxu0 %v1467_v63 }
  0x91   :  { %810 = vmatpush1.bf16.msra.mxu0 %v1465_v0 }
  0x94   :  { %812 = vmatmul.mubr.bf16.vlgmr.msra.gmra.mrb[0].mxu0 %v90_v1 }
 0x12c   :  { %v731_v13 = vpop.f32.mrb[0].mxu1 }
 0x12d   :  { %v733_v14 = vpop.f32.mrb[1].mxu1  ;;  %v732_v28 = vadd.f32 %v731_v13, %v196_v26 }
 0x12e   :  { %v735_v15 = vpop.f32.mrb[2].mxu1  ;;  %v734_v29 = vadd.f32 %v733_v14, %v200_v27 }
 0x12f   :  { %v736_v16 = vpop.f32.mrb[3].mxu1 }
 0x134   :  { %v854_v17 = vpop.f32.mrb[4].mxu1 }
 0x135   :  { %v856_v18 = vpop.f32.mrb[5].mxu1 }
 0x136   :  { %v858_v20 = vpop.f32.mrb[6].mxu1 }
 0x137   :  { %v859_v21 = vpop.f32.mrb[7].mxu1 }
 0x167   :  { %v813_v31 = vpop.f32.mrb[0].mxu0 }
 0x168   :  { %v1303_v32 = vadd.f32 %v813_v31, %v732_v28  ;;  %v815_v33 = vpop.f32.mrb[1].mxu0 }
 0x169   :  { %v1306_v34 = vadd.f32 %v815_v33, %v734_v29  ;;  %v817_v35 = vpop.f32.mrb[2].mxu0 }
 0x16a   :  { %v1304_v36 = vadd.f32 %v1303_v32, %v854_v17  ;;  %v818_v37 = vpop.f32.mrb[3].mxu0 }
 0x16b   :  { %v1307_v38 = vadd.f32 %v1306_v34, %v856_v18 }
 0x16c   :  { %v861_v39 = vmax.f32 %v1304_v36, 0.0 }
 0x16d   :  { %v862_v40 = vmax.f32 %v1307_v38, 0.0 }
 0x16e   :  { %v863_v19 = vpack.c.bf16 %v861_v39, %v861_v39 }
 0x16f   :  { %v864_v41 = vpack.c.bf16 %v862_v40, %v862_v40 }
 0x171   :  { %1032 = vmatprep.mubr.bf16.mxu1 %v864_v41 }
 0x172   :  { %1033 = vmatmul.mubr.bf16.vlgmr.msra.gmra.mrb[8].mxu1 %v863_v19 }
 0x173   :  { %1291 = vmatpush3.bf16.msra.mxu1 %v1485_v30  ;;  %1298 = vmatprep.mubr.msk.bf16.mxu1 %vm1543_vm1, %v1542_v12 }
 0x174   :  { %1292 = vmatprep.subr.bf16.mxu1 %v1542_v12 }
 0x177   :  { %1293 = vmatpush3.bf16.msra.mxu1 %v1486_v42 }
 0x178   :  { %1294 = vmatprep.subr.bf16.mxu1 %v1542_v12 }
 0x17b   :  { %1295 = vmatpush3.bf16.msra.mxu1 %v1487_v43 }
 0x17c   :  { %1296 = vmatprep.subr.bf16.mxu1 %v1542_v12 }
 0x17f   :  { %1297 = vmatpush3.bf16.msra.mxu1 %v1488_v44 }
 0x245   :  { %v1279_v45 = vpop.f32.mrb[8].mxu1 }
 0x246   :  { %v1280_v46 = vpop.f32.mrb[9].mxu1 }
 0x247   :  { %v1281_v47 = vadd.f32 %v1280_v46, %v1279_v45  ;;  %v1282_v48 = vpop.f32.mrb[10].mxu1 }
 0x248   :  { %v1283_v49 = vpop.f32.mrb[11].mxu1 }
 0x249   :  { %v1035_v50 = vadd.f32 %v1281_v47, %v1240_v25 }
 0x24b   :  { %v1040_v51 = vmax.f32 %v1035_v50, 0.0 }
 0x24d   :  { %v1041_v52 = vpack.c.bf16 %v1040_v51, %v1040_v51 }
 0x24f   :  { %1299 = vmatmul.mubr.msk.bf16.vlgmr.msra.gmra.mrb[12].mxu1 %vm1081_vm2, %v1041_v52 }
 0x322   :  { %v1119_v54 = vpop.f32.mrb[12].mxu1 }
 0x323   :  { %v1120_v55 = vadd.f32 %v1257_v53, %v1119_v54  ;;  %v1300_v56 = vpop.f32.mrb[13].mxu1 }
 0x324   :  { %v1122_v57 = vpop.f32.mrb[14].mxu1 }
 0x325   :  { %1125 = vst [vmem:[#allocation5] sm:$0x3] %v1120_v55  ;;  %v1301_v58 = vpop.f32.mrb[15].mxu1 }
 0x326   :  { %1522 = shalt.err (!%p1519_p12)
}
 0x327   :  { %s1523_s6 = scalar_lea.hbm %s1720_s7, 32 }
 0x328   :  { %p1524_p13 = scmp.ne.s32.totalorder %s1720_s7, %s1523_s6  ;;  %p1527_p0 = scmp.lt.u32.totalorder %s1523_s6, %s1720_s7 }
 0x32a   :  { %p1529_p1 = pnand %p1527_p0, %p1524_p13 }
 0x32c   :  { %1532 = shalt.err (!%p1529_p1)
}
 0x32d   :  { %1135 = dma.vmem_to_hbm [thread:$0]  %s1133_s13, 32, %s1720_s7, [#allocation4]  }
 0x32e   :  { %1535 = dma.done.wait [#allocation4], 32  }
 0x32f   :  { %1536 = vsyncadd [#allocation4], 4294967264 }
 0x330   :  { %1139 = vsyncpa [#allocation3], 1 }
 0x331   :  { %1140 = vsyncpa [#allocation4], 1 }

</bundles_post_ra>
